<compile_context>
chip_gen: v7x
topology: tpu7x:2x2x1
jax: 0.10.0
libtpu: 0.0.40
codegen_flags: <defaults>
</compile_context>

<pallas_src>
import functools

import numpy as np

import jax
import jax.numpy as jnp
from jax.experimental import pallas as pl
from jax.experimental.pallas import tpu as pltpu


_MARGIN = 2 << 20                      # slack for Mosaic internal scratch
_VMEM_BUDGET = {                       # per-generation vmem_limit ceiling
    "v5e": 100 << 20,
    "v5p": 100 << 20,
    "v4":  100 << 20,
    "v6e":  96 << 20,
    "v7x":  48 << 20,                  # 64 MiB physical -> leave headroom
}


def _round_up(x: int, m: int) -> int:
    return ((x + m - 1) // m) * m


def _tpu_generation() -> str:
    try:
        kind = jax.devices()[0].device_kind.lower()
    except Exception:
        return "unknown"
    if "v5e" in kind or "v5 lite" in kind or "v5lite" in kind:
        return "v5e"
    if "v7" in kind:
        return "v7x"
    if "v6" in kind:
        return "v6e"
    if "v5" in kind:
        return "v5p"
    if "v4" in kind:
        return "v4"
    return "unknown"


@functools.lru_cache(maxsize=None)
def _bilinear_weights_np(out_size: int, in_size: int) -> np.ndarray:
    """Dense (out_size, in_size) interpolation matrix matching
    F.interpolate(mode='bilinear', align_corners=False) along one axis."""
    i = np.arange(out_size, dtype=np.float64)
    src = (i + 0.5) * (in_size / out_size) - 0.5
    src = np.maximum(src, 0.0)                    # PyTorch clamps negative coords
    i0 = np.floor(src).astype(np.int64)
    frac = (src - i0).astype(np.float32)
    i0 = np.clip(i0, 0, in_size - 1)
    i1 = np.clip(i0 + 1, 0, in_size - 1)
    w = np.zeros((out_size, in_size), np.float32)
    rows = np.arange(out_size)
    np.add.at(w, (rows, i0), 1.0 - frac)
    np.add.at(w, (rows, i1), frac)
    return w


# --------------------------------------------------------------------------- #
# Kernels
# --------------------------------------------------------------------------- #
def _resize_body(wy_ref, x_ref, wxt_ref, o_ref, acc_ref, stats_ref, *,
                 apply_log, num_k):
    k = pl.program_id(1)
    partial = jnp.dot(wy_ref[...], x_ref[...],
                      preferred_element_type=jnp.float32)

    if num_k > 1:
        @pl.when(k == 0)
        def _init():
            acc_ref[...] = partial

        @pl.when(k > 0)
        def _acc():
            acc_ref[...] = acc_ref[...] + partial

    @pl.when(k == num_k - 1)
    def _finalize():
        t = partial if num_k == 1 else acc_ref[...]
        out = jnp.dot(t.astype(jnp.bfloat16), wxt_ref[...],
                      preferred_element_type=jnp.float32)
        if apply_log:
            out = jnp.log1p(jnp.maximum(out, 0.0))
        o_ref[...] = out
        if stats_ref is not None:
            # Per-row-tile partial sums (lane 0 = sum, lane 1 = sum of squares).
            # Zero-padded rows/cols contribute exactly 0, so the wrapper can use
            # the true element count.
            s = jnp.sum(out)
            s2 = jnp.sum(out * out)
            lane = jax.lax.broadcasted_iota(jnp.int32, stats_ref.shape, 2)
            stats_ref[...] = (jnp.where(lane == 0, s, 0.0)
                              + jnp.where(lane == 1, s2, 0.0))


def _resize_kernel(wy_ref, x_ref, wxt_ref, o_ref, *scratch, apply_log, num_k):
    acc_ref = scratch[0] if scratch else None
    _resize_body(wy_ref, x_ref, wxt_ref, o_ref, acc_ref, None,
                 apply_log=apply_log, num_k=num_k)


def _resize_stats_kernel(wy_ref, x_ref, wxt_ref, o_ref, stats_ref, *scratch,
                         apply_log, num_k):
    acc_ref = scratch[0] if scratch else None
    _resize_body(wy_ref, x_ref, wxt_ref, o_ref, acc_ref, stats_ref,
                 apply_log=apply_log, num_k=num_k)


def _normalize_kernel(scal_ref, x_ref, o_ref):
    mean = scal_ref[0]
    inv_std = scal_ref[1]
    o_ref[...] = (x_ref[...] - mean) * inv_std


# --------------------------------------------------------------------------- #
# Wrapper
# --------------------------------------------------------------------------- #
def _resize_footprint(tm, tk, cols_in, cols_pad, normalize):
    """Conservative VMEM footprint (everything budgeted double-buffered)."""
    b = 2 * tm * tk * 2                 # Wy tiles (bf16)
    b += 2 * tk * cols_in * 2           # x blocks (bf16)
    b += 2 * cols_in * cols_pad * 2     # WxT blocks (bf16)
    b += 2 * tm * cols_pad * 4          # output tiles (f32)
    b += tm * cols_in * 4               # accumulator / intermediate (f32)
    if normalize:
        b += 2 * 8 * 128 * 4            # per-tile stats block
    return b


def _simple_resize_impl(img, size, apply_log, normalize):
    if img.ndim == 2:
        img = img[None]
    elif img.ndim == 3 and img.shape[0] != 1:
        img = img[:1]
    assert img.ndim == 3 and img.shape[0] == 1, "expected (H,W) or (C,H,W) input"

    h_in, w_in = int(img.shape[-2]), int(img.shape[-1])
    h_out, w_out = int(size[0]), int(size[1])
    plane = img[0]

    gen = _tpu_generation()
    budget = _VMEM_BUDGET.get(gen, 48 << 20)
    tm_pref = 256 if gen in ("v6e", "v7x") else 128   # 2x256 MXU vs 4x128 MXU

    # Static association-order choice: (Wy@x)@WxT vs the transposed problem.
    cost_direct = h_out * w_in * (h_in + w_out)
    cost_swapped = w_out * h_in * (w_in + h_out)
    swapped = cost_swapped < cost_direct
    if swapped:
        plane = plane.T
        rows_in, cols_in, rows_out, cols_out = w_in, h_in, w_out, h_out
    else:
        rows_in, cols_in, rows_out, cols_out = h_in, w_in, h_out, w_out

    # Row tiling of the output; lane-dense (multiple-of-128) output columns.
    tm = _round_up(rows_out, 16) if rows_out <= tm_pref else tm_pref
    rows_pad = _round_up(rows_out, tm)
    cols_pad = _round_up(cols_out, 128)
    num_i = rows_pad // tm

    # Tiny problems: collapse to a single grid step on single-TC chips.
    if (gen != "v7x" and num_i > 1 and rows_pad <= 2048
            and _resize_footprint(rows_pad, rows_in, cols_in, cols_pad,
                                  normalize) + _MARGIN <= budget):
        tm = rows_pad
        num_i = 1

    # K-tiling over input rows only if the resident plane blows the VMEM budget.
    if _resize_footprint(tm, rows_in, cols_in, cols_pad,
                         normalize) + _MARGIN <= budget:
        tk, rows_in_pad, num_k = rows_in, rows_in, 1
    else:
        tk = 128
        for cand in (2048, 1024, 512, 256, 128):
            if _resize_footprint(tm, cand, cols_in, cols_pad,
                                 normalize) + _MARGIN <= budget:
                tk = cand
                break
        rows_in_pad = _round_up(rows_in, tk)
        num_k = rows_in_pad // tk

    # Interpolation weights (cached on static shapes), zero-padded, cast bf16.
    wy = _bilinear_weights_np(rows_out, rows_in)
    wx = _bilinear_weights_np(cols_out, cols_in)
    wy_p = np.zeros((rows_pad, rows_in_pad), np.float32)
    wy_p[:rows_out, :rows_in] = wy
    wxt_p = np.zeros((cols_in, cols_pad), np.float32)
    wxt_p[:, :cols_out] = wx.T
    wy_b = jnp.asarray(wy_p, dtype=jnp.bfloat16)
    wxt_b = jnp.asarray(wxt_p, dtype=jnp.bfloat16)
    x_b = plane.astype(jnp.bfloat16)
    if rows_in_pad > rows_in:
        x_b = jnp.pad(x_b, ((0, rows_in_pad - rows_in), (0, 0)))

    # Grid-invariant blocks: single-buffer them (budget still assumes 2x).
    invariant = {"pipeline_mode": pl.Buffered(1)} if hasattr(pl, "Buffered") else {}
    x_kwargs = invariant if num_k == 1 else {}
    in_specs = [
        pl.BlockSpec((tm, tk), lambda i, k: (i, k)),
        pl.BlockSpec((tk, cols_in), lambda i, k: (k, 0), **x_kwargs),
        pl.BlockSpec((cols_in, cols_pad), lambda i, k: (0, 0), **invariant),
    ]
    out_tile_spec = pl.BlockSpec((tm, cols_pad), lambda i, k: (i, 0))
    scratch_shapes = ([pltpu.VMEM((tm, cols_in), jnp.float32)]
                      if num_k > 1 else [])

    needed = _resize_footprint(tm, tk, cols_in, cols_pad, normalize)
    vmem_limit = int(min(max(needed + (4 << 20), 16 << 20), budget))

    flops = 2 * (rows_pad * rows_in_pad * cols_in + rows_pad * cols_in * cols_pad)
    cost = pl.CostEstimate(
        flops=flops,
        transcendentals=rows_pad * cols_pad if apply_log else 0,
        bytes_accessed=2 * (int(wy_b.size) + int(x_b.size) + int(wxt_b.size))
        + 4 * rows_pad * cols_pad,
    )
    compiler_params = pltpu.CompilerParams(
        dimension_semantics=("parallel", "arbitrary"),
        vmem_limit_bytes=vmem_limit)
    grid = (num_i, num_k)

    if normalize:
        # Resize + per-row-tile partial (sum, sum_sq); grid stays "parallel".
        out_pad, stats = pl.pallas_call(
            functools.partial(_resize_stats_kernel, apply_log=apply_log,
                              num_k=num_k),
            out_shape=(jax.ShapeDtypeStruct((rows_pad, cols_pad), jnp.float32),
                       jax.ShapeDtypeStruct((num_i, 8, 128), jnp.float32)),
            grid=grid,
            in_specs=in_specs,
            out_specs=(out_tile_spec,
                       pl.BlockSpec((1, 8, 128), lambda i, k: (i, 0, 0))),
            scratch_shapes=scratch_shapes,
            compiler_params=compiler_params,
            cost_estimate=cost,
        )(wy_b, x_b, wxt_b)

        n = rows_out * cols_out
        total = jnp.sum(stats[:, 0, 0])
        total_sq = jnp.sum(stats[:, 0, 1])
        mean = total / n
        # torch.Tensor.std() is unbiased (ddof=1); tiny floor guards against
        # NaN/Inf for constant outputs and negative rounding error.
        # TODO(synk): Welford-style per-tile (count, mean, M2) combine would be
        #             more robust than E[x^2]-E[x]^2 for apply_log=False inputs
        #             with a very large mean.
        var = (total_sq - n * mean * mean) / max(n - 1, 1)
        inv_std = jax.lax.rsqrt(jnp.maximum(var, 1e-12))
        scal = jnp.stack([mean, inv_std]).astype(jnp.float32)

        # Mem-bound elementwise pass: use as large a row chunk as fits VMEM.
        def _norm_fp(t):
            return 4 * t * cols_pad * 4          # in+out, double-buffered, f32

        norm_tm = rows_pad
        if _norm_fp(norm_tm) + _MARGIN > budget:
            norm_tm = 8
            for d in range(2, rows_pad // 8 + 1):
                if rows_pad % d == 0:
                    t = rows_pad // d
                    if t % 8 == 0 and _norm_fp(t) + _MARGIN <= budget:
                        norm_tm = t
                        break
        if gen == "v7x" and norm_tm == rows_pad and rows_pad >= 16:
            norm_tm = rows_pad // 2               # give both TCs a tile

        out_pad = pl.pallas_call(
            _normalize_kernel,
            out_shape=jax.ShapeDtypeStruct((rows_pad, cols_pad), jnp.float32),
            grid=(rows_pad // norm_tm,),
            in_specs=[pl.BlockSpec(memory_space=pltpu.MemorySpace.SMEM),
                      pl.BlockSpec((norm_tm, cols_pad), lambda i: (i, 0))],
            out_specs=pl.BlockSpec((norm_tm, cols_pad), lambda i: (i, 0)),
            input_output_aliases={1: 0},          # reuse the intermediate's HBM
            compiler_params=pltpu.CompilerParams(
                dimension_semantics=("parallel",),
                vmem_limit_bytes=int(min(max(_norm_fp(norm_tm) + (4 << 20),
                                             16 << 20), budget))),
        )(scal, out_pad)
    else:
        out_pad = pl.pallas_call(
            functools.partial(_resize_kernel, apply_log=apply_log, num_k=num_k),
            out_shape=jax.ShapeDtypeStruct((rows_pad, cols_pad), jnp.float32),
            grid=grid,
            in_specs=in_specs,
            out_specs=out_tile_spec,
            scratch_shapes=scratch_shapes,
            compiler_params=compiler_params,
            cost_estimate=cost,
        )(wy_b, x_b, wxt_b)

    out = out_pad[:rows_out, :cols_out]
    if swapped:
        out = out.T
    # PyTorch: (1,1,H,W).squeeze(0) -> (1, H_out, W_out)
    return out[None]


_simple_resize_jit = jax.jit(
    _simple_resize_impl, static_argnames=("size", "apply_log", "normalize"))


def simple_resize(img, size=(256, 256), apply_log=True, normalize=False):
    """Pallas implementation of SimpleResize.forward (returns (1, H_out, W_out))."""
    img = jnp.asarray(img, jnp.float32)
    return _simple_resize_jit(img, size=tuple(int(s) for s in size),
                              apply_log=bool(apply_log),
                              normalize=bool(normalize))


# --------------------------------------------------------------------------- #
# Reference (pure numpy, f32) and tests
# --------------------------------------------------------------------------- #
def _reference(img, size=(256, 256), apply_log=True, normalize=False):
    img = np.asarray(img, np.float32)
    if img.ndim == 2:
        img = img[None]
    elif img.ndim == 3 and img.shape[0] != 1:
        img = img[:1]
    x = img[0]
    h_out, w_out = size
    wy = _bilinear_weights_np(h_out, x.shape[0])
    wx = _bilinear_weights_np(w_out, x.shape[1])
    out = wy @ x @ wx.T
    if apply_log:
        out = np.log1p(np.maximum(out, 0.0))
    if normalize:
        out = (out - out.mean()) / out.std(ddof=1)
    return out[None]


def _check(got, want, max_tol, mean_tol):
    err = np.abs(np.asarray(got, np.float32) - np.asarray(want, np.float32))
    assert err.max() <= max_tol and err.mean() <= mean_tol, (err.max(), err.mean())


if __name__ == "__main__":
    key = jax.random.PRNGKey(0)
    k1, k2, k3 = jax.random.split(key, 3)

    # (C, H, W) multi-channel input; the module keeps only channel 0.
    img1 = jax.random.uniform(k1, (4, 16, 16), jnp.float32, minval=-0.5, maxval=3.0)
    out1 = jax.block_until_ready(simple_resize(img1, size=(32, 32)))
    assert out1.shape == (1, 32, 32), out1.shape
    _check(out1, _reference(np.asarray(img1), size=(32, 32)), 0.1, 0.02)

    # 2-D input, default 256x256 target, normalize path (per-tile stats + alias).
    img2 = jax.random.uniform(k2, (16, 16), jnp.float32, minval=-0.5, maxval=3.0)
    out2 = jax.block_until_ready(
        simple_resize(img2, size=(256, 256), apply_log=True, normalize=True))
    assert out2.shape == (1, 256, 256), out2.shape
    _check(out2, _reference(np.asarray(img2), size=(256, 256), normalize=True),
           0.3, 0.06)

    # Asymmetric resize that exercises the swapped association order.
    img3 = jax.random.uniform(k3, (8, 24), jnp.float32, minval=-0.5, maxval=3.0)
    out3 = jax.block_until_ready(simple_resize(img3, size=(64, 16)))
    assert out3.shape == (1, 64, 16), out3.shape
    _check(out3, _reference(np.asarray(img3), size=(64, 16)), 0.1, 0.02)

    print("KERNEL_OK")
</pallas_src>

<mosaic_0001>
module attributes {stable_mosaic.version = 11 : i64} {
  func.func @_resize_kernel(%arg0: i32, %arg1: i32, %arg2: memref<32x16xbf16, #tpu.memory_space<vmem>>, %arg3: memref<16x16xbf16, #tpu.memory_space<vmem>>, %arg4: memref<16x128xbf16, #tpu.memory_space<vmem>>, %arg5: memref<32x128xf32, #tpu.memory_space<vmem>>) attributes {dimension_semantics = [#tpu.dimension_semantics<parallel>, #tpu.dimension_semantics<arbitrary>], iteration_bounds = array<i64: 1, 1>, scalar_prefetch = 0 : i64, scratch_operands = 0 : i64, tpu.core_type = #tpu.core_type<tc>, window_params = [{transform_indices = @transform_0, window_bounds = array<i64: 32, 16>}, {pipeline_mode = #tpu.pipeline_mode<synchronous>, transform_indices = @transform_1, window_bounds = array<i64: 16, 16>}, {pipeline_mode = #tpu.pipeline_mode<synchronous>, transform_indices = @transform_2, window_bounds = array<i64: 16, 128>}, {transform_indices = @transform_3, window_bounds = array<i64: 32, 128>}]} {
    %c0 = arith.constant 0 : index
    %c0_0 = arith.constant 0 : index
    %0 = vector.load %arg2[%c0, %c0_0] : memref<32x16xbf16, #tpu.memory_space<vmem>>, vector<32x16xbf16>
    %c0_1 = arith.constant 0 : index
    %c0_2 = arith.constant 0 : index
    %1 = vector.load %arg3[%c0_1, %c0_2] : memref<16x16xbf16, #tpu.memory_space<vmem>>, vector<16x16xbf16>
    %cst = arith.constant dense<0.000000e+00> : vector<32x16xf32>
    %2 = tpu.matmul %0, %1, %cst {dimension_numbers = #tpu.dot_dimension_numbers<[1], [0], [0], [1], [0, 0, 1, 1], [], []>} : vector<32x16xbf16>, vector<16x16xbf16>, vector<32x16xf32> -> vector<32x16xf32>
    %c0_i32 = arith.constant 0 : i32
    %3 = arith.cmpi eq, %arg1, %c0_i32 : i32
    %4 = arith.extui %3 : i1 to i32
    %c0_i32_3 = arith.constant 0 : i32
    %5 = arith.cmpi ne, %4, %c0_i32_3 : i32
    scf.if %5 {
      %6 = arith.truncf %2 : vector<32x16xf32> to vector<32x16xbf16>
      %c0_4 = arith.constant 0 : index
      %c0_5 = arith.constant 0 : index
      %7 = vector.load %arg4[%c0_4, %c0_5] : memref<16x128xbf16, #tpu.memory_space<vmem>>, vector<16x128xbf16>
      %cst_6 = arith.constant dense<0.000000e+00> : vector<32x128xf32>
      %8 = tpu.matmul %6, %7, %cst_6 {dimension_numbers = #tpu.dot_dimension_numbers<[1], [0], [0], [1], [0, 0, 1, 1], [], []>} : vector<32x16xbf16>, vector<16x128xbf16>, vector<32x128xf32> -> vector<32x128xf32>
      %cst_7 = arith.constant 0.000000e+00 : f32
      %9 = vector.broadcast %cst_7 : f32 to vector<32x128xf32>
      %10 = arith.maximumf %8, %9 : vector<32x128xf32>
      %11 = math.log1p %10 : vector<32x128xf32>
      %c0_8 = arith.constant 0 : index
      %c0_9 = arith.constant 0 : index
      %12 = vector.load %arg5[%c0_8, %c0_9] : memref<32x128xf32, #tpu.memory_space<vmem>>, vector<32x128xf32>
      tpu.vector_store %arg5[%c0_8, %c0_9], %11 {strides = array<i32>} : memref<32x128xf32, #tpu.memory_space<vmem>>, vector<32x128xf32>,
    } else {
    }
    return
  }
  func.func @transform_0(%arg0: i32, %arg1: i32) -> (i32, i32) {
    %c0_i32 = arith.constant 0 : i32
    return %arg0, %arg1 : i32, i32
  }
  func.func @transform_1(%arg0: i32, %arg1: i32) -> (i32, i32) {
    %c0_i32 = arith.constant 0 : i32
    %c0_i32_0 = arith.constant 0 : i32
    return %arg1, %c0_i32 : i32, i32
  }
  func.func @transform_2(%arg0: i32, %arg1: i32) -> (i32, i32) {
    %c0_i32 = arith.constant 0 : i32
    %c0_i32_0 = arith.constant 0 : i32
    %c0_i32_1 = arith.constant 0 : i32
    return %c0_i32, %c0_i32_0 : i32, i32
  }
  func.func @transform_3(%arg0: i32, %arg1: i32) -> (i32, i32) {
    %c0_i32 = arith.constant 0 : i32
    %c0_i32_0 = arith.constant 0 : i32
    return %arg0, %c0_i32 : i32, i32
  }
}

</mosaic_0001>

<bundles_post_ra>
// kernel: _simple_resize_impl.1
= control target key start
LH: loop header
LB: loop body
LE: loop exit
PB: predicated region body
PF: predicated region fallthrough
CT: control target
= control target key end

     0   :  { %vm37_vm0 = vcmask 130048   ;;  %s296_s1 = inlined_call_operand.vmem [shape: bf16[16,16], index: 1, kind: input, shape index: {}]   ;;  %s297_s0 = inlined_call_operand.vmem [shape: bf16[32,16], index: 0, kind: input, shape index: {}]   ;;  %s298_s2 = inlined_call_operand.vmem [shape: bf16[16,128], index: 2, kind: input, shape index: {}]   ;;  %s299_s3 = inlined_call_operand.vmem [shape: f32[32,128], index: 3, kind: output, shape index: {}]  }
   0x1   :  { %v236_v0 = vld [vmem:[%s296_s1] sm:$0xff]   ;;  %v238_v2 = vld [vmem:[%s297_s0 + $0x8] sm:$0xff]  }
   0x2   :  { %v237_v1 = vld [vmem:[%s297_s0] sm:$0xff]   ;;  %224 = vmatprep.subr.bf16.mxu0 %v236_v0 }
   0x3   :  { %225 = vmatpush3.bf16.msra.mxu0 %v236_v0  ;;  %226 = vmatprep.mubr.msk.bf16.mxu0 %vm37_vm0, %v237_v1  ;;  %v239_v3 = vld [vmem:[%s298_s2] sm:$0xff]  }
   0x4   :  { %230 = vmatprep.subr.bf16.mxu1 %v239_v3 }
   0x5   :  { %231 = vmatpush3.bf16.msra.mxu1 %v239_v3 }
   0x6   :  { %227 = vmatmul.mubr.msk.bf16.vlgmr.msra.gmra.mrb[0].mxu0 %vm37_vm0, %v238_v2 }
  0xd9   :  { %v228_v4 = vpop.f32.mrb[0].mxu0 }
  0xda   :  { %v78_v5 = vpop.f32.mrb[1].mxu0 }
  0xdb   :  { %v229_v6 = vpop.f32.mrb[2].mxu0 }
  0xdc   :  { %v98_v7 = vpack.c.bf16 %v229_v6, %v228_v4  ;;  %v81_v8 = vpop.f32.mrb[3].mxu0 }
  0xdd   :  { %v97_v9 = vpack.c.bf16 %v81_v8, %v78_v5 }
  0xdf   :  { %232 = vmatprep.mubr.msk.bf16.mxu1 %vm37_vm0, %v97_v9 }
  0xe0   :  { %233 = vmatmul.mubr.msk.bf16.vlgmr.msra.gmra.mrb[0].mxu1 %vm37_vm0, %v98_v7 }
 0x1b3   :  { %v234_v10 = vpop.f32.mrb[0].mxu1 }
 0x1b4   :  { %v164_v11 = vmax.f32 %v234_v10, 0.0  ;;  %v147_v12 = vpop.f32.mrb[1].mxu1 }
 0x1b5   :  { %v162_v13 = vmax.f32 %v147_v12, 0.0  ;;  %v235_v14 = vpop.f32.mrb[2].mxu1 }
 0x1b6   :  { %v184_v15 = vadd.f32 1.0, %v164_v11  ;;  %v165_v16 = vmax.f32 %v235_v14, 0.0  ;;  %v150_v17 = vpop.f32.mrb[3].mxu1  ;;  %v187_v22 = vmul.f32 -0.5, %v164_v11  ;;  %v190_v27 = vand.u32 2147483647, %v164_v11 }
 0x1b7   :  { %v166_v18 = vadd.f32 1.0, %v162_v13  ;;  %v163_v19 = vmax.f32 %v150_v17, 0.0  ;;  %v169_v23 = vmul.f32 -0.5, %v162_v13  ;;  %v172_v29 = vand.u32 2147483647, %v162_v13 }
 0x1b8   :  { %240 = vlog2.f32 %v184_v15  ;;  %v193_v20 = vadd.f32 1.0, %v165_v16  ;;  %v196_v24 = vmul.f32 -0.5, %v165_v16  ;;  %v188_v25 = vadd.f32 1.0, %v187_v22 }
 0x1b9   :  { %242 = vlog2.f32 %v166_v18  ;;  %v175_v21 = vadd.f32 1.0, %v163_v19  ;;  %v178_v26 = vmul.f32 -0.5, %v163_v19  ;;  %v170_v28 = vadd.f32 1.0, %v169_v23 }
 0x1ba   :  { %244 = vlog2.f32 %v193_v20  ;;  %v197_v30 = vadd.f32 1.0, %v196_v24  ;;  %v199_v32 = vand.u32 2147483647, %v165_v16  ;;  %v189_v35 = vmul.f32 %v188_v25, %v164_v11 }
 0x1bb   :  { %246 = vlog2.f32 %v175_v21  ;;  %v179_v36 = vadd.f32 1.0, %v178_v26  ;;  %vm191_vm1 = vcmp.lt.f32.partialorder %v190_v27, 0.0004427343  ;;  %v171_v39 = vmul.f32 %v170_v28, %v162_v13 }
 0x1bc   :  { %v181_v40 = vand.u32 2147483647, %v163_v19  ;;  %vm173_vm2 = vcmp.lt.f32.partialorder %v172_v29, 0.0004427343  ;;  %v198_v43 = vmul.f32 %v197_v30, %v165_v16  ;;  %vm200_vm3 = vcmp.lt.f32.partialorder %v199_v32, 0.0004427343 }
 0x1bd   :  { %v180_v48 = vmul.f32 %v179_v36, %v163_v19 }
 0x1be   :  { %vm182_vm4 = vcmp.lt.f32.partialorder %v181_v40, 0.0004427343 }
 0x1c2   :  { %v241_v31 = vpop.eup %240 }
 0x1c3   :  { %v243_v33 = vpop.eup %242  ;;  %v186_v34 = vmul.f32 0.6931472, %v241_v31 }
 0x1c4   :  { %v245_v37 = vpop.eup %244  ;;  %v168_v38 = vmul.f32 0.6931472, %v243_v33 }
 0x1c5   :  { %v192_v41 = vsel %vm191_vm1, %v189_v35, %v186_v34  ;;  %v195_v42 = vmul.f32 0.6931472, %v245_v37  ;;  %v247_v44 = vpop.eup %246 }
 0x1c6   :  { %204 = vst [vmem:[%s299_s3 + $0x10] sm:$0xff] %v192_v41  ;;  %v174_v45 = vsel %vm173_vm2, %v171_v39, %v168_v38  ;;  %v177_v47 = vmul.f32 0.6931472, %v247_v44 }
 0x1c7   :  { %202 = vst [vmem:[%s299_s3] sm:$0xff] %v174_v45  ;;  %v201_v46 = vsel %vm200_vm3, %v198_v43, %v195_v42 }
 0x1c8   :  { %205 = vst [vmem:[%s299_s3 + $0x18] sm:$0xff] %v201_v46  ;;  %v183_v49 = vsel %vm182_vm4, %v180_v48, %v177_v47 }
 0x1c9   :  { %203 = vst [vmem:[%s299_s3 + $0x8] sm:$0xff] %v183_v49 }

</bundles_post_ra>
